<compile_context>
chip_gen: v7x
topology: tpu7x:2x2x1
jax: 0.10.0
libtpu: 0.0.40
codegen_flags: <defaults>
</compile_context>

<pallas_src>
import jax
import jax.numpy as jnp
from jax.experimental import pallas as pl
from jax.experimental.pallas import tpu as pltpu


# ~2 MiB per block.  Double-buffered in + out blocks => <= 8 MiB live VMEM.
_BLOCK_BYTES = 2 * 1024 * 1024


def _copy_kernel(mem_ref, out_ref):
    # Pure pass-through store; keeps the kernel strictly DMA/store-bound.
    out_ref[...] = mem_ref[...]


def _choose_2d_view(memory):
    """Pick a (rows, width) presentation of `memory`, lane-dense if possible."""
    n = int(memory.size)
    if memory.ndim >= 1:
        last = int(memory.shape[-1])
    else:
        last = 1

    # Preferred: keep the trailing dim as the lane axis when it is already a
    # multiple of 128 (typical d_model).
    if memory.ndim >= 2 and last % 128 == 0:
        return n // last, last

    # Otherwise flatten and pick the largest 128-multiple width that divides n.
    if n % 128 == 0:
        for width in (2048, 1024, 512, 256, 128):
            if n % width == 0:
                return n // width, width

    # Last resort (n not 128-divisible): keep the trailing dim as the width.
    # Block width == full array width, so the (8,128) rule is still satisfied;
    # stores may be masked but VMEM stays bounded via row tiling.
    if memory.ndim >= 2 and last > 0:
        return n // last, last
    return 1, max(n, 1)


def _row_tile(rows, width, itemsize):
    """Largest sublane-aligned row tile whose block stays under _BLOCK_BYTES."""
    bytes_per_row = max(1, width * itemsize)
    max_rows = max(8, _BLOCK_BYTES // bytes_per_row)
    if rows <= max_rows:
        return rows                      # single block == full rows dim (legal)
    tile = (max_rows // 8) * 8           # multiple of 8 -> sublane-aligned
    return max(tile, 8)                  # ragged last block handled by Pallas


def _pallas_identity_copy(memory):
    """Tiled Pallas copy of `memory` (exact identity on values)."""
    rows, width = _choose_2d_view(memory)
    flat = memory.reshape(rows, width)
    tile = _row_tile(rows, width, memory.dtype.itemsize)
    grid = (pl.cdiv(rows, tile),)

    out = pl.pallas_call(
        _copy_kernel,
        out_shape=jax.ShapeDtypeStruct((rows, width), memory.dtype),
        grid=grid,
        in_specs=[pl.BlockSpec((tile, width), lambda i: (i, 0))],
        out_specs=pl.BlockSpec((tile, width), lambda i: (i, 0)),
        compiler_params=pltpu.CompilerParams(
            dimension_semantics=("parallel",)),
    )(flat)
    return out.reshape(memory.shape)


def dummy_decoder_forward(tgt, memory, tgt_mask=None, memory_mask=None,
                          tgt_key_padding_mask=None,
                          memory_key_padding_mask=None):
    """Pallas equivalent of DummyDecoder.forward: returns `memory` (by value).

    All arguments other than `memory` are ignored, matching the PyTorch
    module, and never reach the pallas_call.
    """
    del tgt, tgt_mask, memory_mask
    del tgt_key_padding_mask, memory_key_padding_mask
    return _pallas_identity_copy(memory)


if __name__ == "__main__":
    key = jax.random.PRNGKey(0)
    k_tgt, k_mem = jax.random.split(key)

    # (seq_len, batch, d_model) -- PyTorch nn.Transformer convention.
    seq_len, batch, d_model = 8, 2, 32
    tgt = jax.random.normal(k_tgt, (seq_len, batch, d_model), dtype=jnp.float32)
    memory = jax.random.normal(k_mem, (seq_len, batch, d_model),
                               dtype=jnp.float32)

    # Masks (ignored by DummyDecoder, passed only for interface fidelity).
    tgt_mask = jnp.zeros((seq_len, seq_len), dtype=jnp.float32)
    memory_mask = None
    tgt_key_padding_mask = jnp.zeros((batch, seq_len), dtype=bool)
    memory_key_padding_mask = jnp.zeros((batch, seq_len), dtype=bool)

    out = dummy_decoder_forward(tgt, memory, tgt_mask, memory_mask,
                                tgt_key_padding_mask, memory_key_padding_mask)
    out = jax.block_until_ready(out)

    assert out.shape == memory.shape and out.dtype == memory.dtype
    assert bool(jnp.all(out == memory))

    print("KERNEL_OK")
</pallas_src>

<mosaic_0001>
module attributes {stable_mosaic.version = 11 : i64} {
  func.func @_copy_kernel(%arg0: i32, %arg1: memref<1x512xf32, #tpu.memory_space<vmem>>, %arg2: memref<1x512xf32, #tpu.memory_space<vmem>>) attributes {dimension_semantics = [#tpu.dimension_semantics<parallel>], iteration_bounds = array<i64: 1>, scalar_prefetch = 0 : i64, scratch_operands = 0 : i64, tpu.core_type = #tpu.core_type<tc>, window_params = [{transform_indices = @transform_0, window_bounds = array<i64: 1, 512>}, {transform_indices = @transform_1, window_bounds = array<i64: 1, 512>}]} {
    %c0 = arith.constant 0 : index
    %c0_0 = arith.constant 0 : index
    %0 = vector.load %arg1[%c0, %c0_0] : memref<1x512xf32, #tpu.memory_space<vmem>>, vector<1x512xf32>
    %c0_1 = arith.constant 0 : index
    %c0_2 = arith.constant 0 : index
    %1 = vector.load %arg2[%c0_1, %c0_2] : memref<1x512xf32, #tpu.memory_space<vmem>>, vector<1x512xf32>
    tpu.vector_store %arg2[%c0_1, %c0_2], %0 {strides = array<i32>} : memref<1x512xf32, #tpu.memory_space<vmem>>, vector<1x512xf32>,
    return
  }
  func.func @transform_0(%arg0: i32) -> (i32, i32) {
    %c0_i32 = arith.constant 0 : i32
    %c0_i32_0 = arith.constant 0 : i32
    return %arg0, %c0_i32 : i32, i32
  }
  func.func @transform_1(%arg0: i32) -> (i32, i32) {
    %c0_i32 = arith.constant 0 : i32
    %c0_i32_0 = arith.constant 0 : i32
    return %arg0, %c0_i32 : i32, i32
  }
}

</mosaic_0001>

<bundles_post_ra>
// kernel: tpu_custom_call.1
= control target key start
LH: loop header
LB: loop body
LE: loop exit
PB: predicated region body
PF: predicated region fallthrough
CT: control target
= control target key end

     0   :  { %6 = vsyncpa [#allocation3], 0  ;;  %s128_s0 = inlined_call_operand.hbm [shape: f32[1,512], index: 0, kind: input, shape index: {}]   ;;  %s129_s1 = inlined_call_operand.hbm [shape: f32[1,512], index: 1, kind: output, shape index: {}]  }
   0x1   :  { %7 = vsyncpa [#allocation4], 0  ;;  %s92_s6 = smov [#allocation2]   ;;  %s44_s10 = scalar_lea.hbm %s128_s0, 64 }
   0x2   :  { %s14_s7 = sshll.u32 %s92_s6, 4  ;;  %p45_p0 = scmp.ne.s32.totalorder %s128_s0, %s44_s10  ;;  %s15_s7 = int_to_ptr.vmem [resolvable:$true] %s14_s7 }
   0x3   :  { %p48_p1 = scmp.lt.u32.totalorder %s44_s10, %s128_s0 }
   0x5   :  { %p50_p2 = pnand %p48_p1, %p45_p0 }
   0x7   :  { %53 = shalt.err (!%p50_p2)
}
   0x8   :  { %s54_s15 = scalar_lea.vmem %s15_s7, 64  ;;  %p59_p4 = scmp.lt.s32.totalorder %s15_s7, %s15_s7 }
   0x9   :  { %p55_p3 = scmp.ne.s32.totalorder %s15_s7, %s54_s15  ;;  %p60_p5 = scmp.lt.s32.totalorder %s54_s15, %s54_s15 }
   0xb   :  { %p61_p6 = por %p60_p5, %p59_p4 }
   0xd   :  { %p62_p7 = pnand %p61_p6, %p55_p3 }
   0xf   :  { %65 = shalt.err (!%p62_p7)
}
  0x10   :  { %17 = dma.hbm_to_vmem [thread:$0]  %s128_s0, 64, %s15_s7, [#allocation3]  }
  0x11   :  { %88 = dma.done.wait [#allocation3], 64  }
  0x12   :  { %89 = vsyncadd [#allocation3], 4294967232  ;;  %v22_v0 = vlaneseq  ;;  %s93_s18 = smov [#allocation5]   ;;  %v21_v1 = vld [vmem:[#allocation2] sm:$0xf] }
  0x13   :  { %s33_s19 = sshll.u32 %s93_s18, 4  ;;  %s34_s19 = int_to_ptr.vmem [resolvable:$true] %s33_s19 }
  0x14   :  { %vm24_vm0 = vcmp.lt.s32.totalorder %v22_v0, 512  ;;  %s66_s20 = scalar_lea.vmem %s34_s19, 64  ;;  %p71_p9 = scmp.lt.s32.totalorder %s34_s19, %s34_s19 }
  0x15   :  { %26 = vst.msk [vmem:[#allocation5] sm:$0xf] %vm24_vm0, %v21_v1  ;;  %p67_p8 = scmp.ne.s32.totalorder %s34_s19, %s66_s20  ;;  %p72_p10 = scmp.lt.s32.totalorder %s66_s20, %s66_s20 }
  0x17   :  { %p73_p11 = por %p72_p10, %p71_p9 }
  0x19   :  { %p74_p12 = pnand %p73_p11, %p67_p8 }
  0x1b   :  { %77 = shalt.err (!%p74_p12)
}
  0x1c   :  { %s78_s0 = scalar_lea.hbm %s129_s1, 64 }
  0x1d   :  { %p79_p13 = scmp.ne.s32.totalorder %s129_s1, %s78_s0  ;;  %p82_p0 = scmp.lt.u32.totalorder %s78_s0, %s129_s1 }
  0x1f   :  { %p84_p1 = pnand %p82_p0, %p79_p13 }
  0x21   :  { %87 = shalt.err (!%p84_p1)
}
  0x22   :  { %36 = dma.vmem_to_hbm [thread:$0]  %s34_s19, 64, %s129_s1, [#allocation4]  }
  0x23   :  { %90 = dma.done.wait [#allocation4], 64  }
  0x24   :  { %91 = vsyncadd [#allocation4], 4294967232 }
  0x25   :  { %40 = vsyncpa [#allocation3], 1 }
  0x26   :  { %41 = vsyncpa [#allocation4], 1 }

</bundles_post_ra>
